<compile_context>
chip_gen: v7x
topology: tpu7x:2x2x1
jax: 0.10.0
libtpu: 0.0.40
codegen_flags: <defaults>
</compile_context>

<pallas_src>
import jax
import jax.numpy as jnp
from jax.experimental import pallas as pl
from jax.experimental.pallas import tpu as pltpu


# ----------------------------- Pallas kernel ------------------------------- #
def mlp_kernel(x_ref, w1_ref, b1_ref, w2_ref, b2_ref, w3_ref, b3_ref, o_ref):
    x = x_ref[...]

    h = jnp.dot(x, w1_ref[...], preferred_element_type=jnp.float32) + b1_ref[...]
    h = jnp.maximum(h, 0.0)

    h = jnp.dot(h, w2_ref[...], preferred_element_type=jnp.float32) + b2_ref[...]
    h = jnp.maximum(h, 0.0)

    h = jnp.dot(h, w3_ref[...], preferred_element_type=jnp.float32) + b3_ref[...]
    h = jnp.maximum(h, 0.0)

    o_ref[...] = h.astype(o_ref.dtype)


# ------------------------------ JAX wrapper -------------------------------- #
D_PAD = 8          # feature padding (covers in=4, hidden=4/3, out=3); zero-pad is exact
TILE_B_MAX = 256   # max rows per batch tile / grid step


def _pad2d(a, rows, cols):
    r, c = a.shape
    return jnp.pad(a, ((0, rows - r), (0, cols - c)))


def pad_params(params):
    """Pad the tiny weights/biases ONCE; reuse the result across forward calls."""
    return {
        "w1": _pad2d(params["w1"], D_PAD, D_PAD),
        "b1": _pad2d(params["b1"][None, :], 1, D_PAD),
        "w2": _pad2d(params["w2"], D_PAD, D_PAD),
        "b2": _pad2d(params["b2"][None, :], 1, D_PAD),
        "w3": _pad2d(params["w3"], D_PAD, D_PAD),
        "b3": _pad2d(params["b3"][None, :], 1, D_PAD),
    }


@jax.jit
def mlp_forward(x, padded):
    """x: (B, 4) float32. padded: output of pad_params (already padded to 8x8)."""
    B = x.shape[0]

    # Batch tiling: sublane-aligned tile, capped at TILE_B_MAX; grid over tiles.
    tile_b = min(TILE_B_MAX, pl.cdiv(B, 8) * 8)
    b_pad = pl.cdiv(B, tile_b) * tile_b
    xp = _pad2d(x.astype(jnp.float32), b_pad, D_PAD)

    x_spec = pl.BlockSpec((tile_b, D_PAD), lambda i: (i, 0))
    w_spec = pl.BlockSpec((D_PAD, D_PAD), lambda i: (0, 0))  # constant index -> resident
    b_spec = pl.BlockSpec((1, D_PAD), lambda i: (0, 0))
    o_spec = pl.BlockSpec((tile_b, D_PAD), lambda i: (i, 0))

    out_pad = pl.pallas_call(
        mlp_kernel,
        out_shape=jax.ShapeDtypeStruct((b_pad, D_PAD), jnp.float32),
        grid_spec=pltpu.PrefetchScalarGridSpec(
            num_scalar_prefetch=0,
            grid=(b_pad // tile_b,),
            in_specs=[x_spec, w_spec, b_spec, w_spec, b_spec, w_spec, b_spec],
            out_specs=o_spec,
        ),
        compiler_params=pltpu.CompilerParams(
            dimension_semantics=("parallel",),  # shards batch tiles across TCs on v7x
        ),
    )(xp, padded["w1"], padded["b1"], padded["w2"], padded["b2"],
      padded["w3"], padded["b3"])

    # Slice back to the real (B, 3) output of fc3 (padded rows/cols discarded).
    return out_pad[:B, :3]


# --------------------------- parameter creation ----------------------------- #
def init_params(key):
    """Deterministic init matching nn.Linear shapes: fc1(4->4), fc2(4->3), fc3(3->3)."""
    ks = jax.random.split(key, 6)

    def uniform(k, shape, fan_in):
        bound = 1.0 / jnp.sqrt(fan_in)
        return jax.random.uniform(k, shape, jnp.float32, -bound, bound)

    return {
        # stored as (in, out) == torch weight.T
        "w1": uniform(ks[0], (4, 4), 4.0),
        "b1": uniform(ks[1], (4,), 4.0),
        "w2": uniform(ks[2], (4, 3), 4.0),
        "b2": uniform(ks[3], (3,), 4.0),
        "w3": uniform(ks[4], (3, 3), 3.0),
        "b3": uniform(ks[5], (3,), 3.0),
    }


def reference_forward(x, p):
    h = jnp.maximum(x @ p["w1"] + p["b1"], 0.0)
    h = jnp.maximum(h @ p["w2"] + p["b2"], 0.0)
    h = jnp.maximum(h @ p["w3"] + p["b3"], 0.0)
    return h


if __name__ == "__main__":
    key = jax.random.PRNGKey(0)
    pkey, xkey = jax.random.split(key)
    params = init_params(pkey)
    padded = pad_params(params)  # pad once; reused for every forward call

    # train.py feeds one sample reshaped to (1, 4); use batch=2 here.
    x = jax.random.normal(xkey, (2, 4), jnp.float32)

    out = jax.block_until_ready(mlp_forward(x, padded))
    ref = reference_forward(x, params)
    assert out.shape == (2, 3), out.shape
    assert jnp.allclose(out, ref, atol=1e-5, rtol=1e-5), (out, ref)

    # Also exercise a multi-tile batch (grid > 1) to validate the batch axis.
    xb = jax.random.normal(xkey, (600, 4), jnp.float32)
    outb = jax.block_until_ready(mlp_forward(xb, padded))
    refb = reference_forward(xb, params)
    assert outb.shape == (600, 3), outb.shape
    assert jnp.allclose(outb, refb, atol=1e-5, rtol=1e-5)

    print("KERNEL_OK")
</pallas_src>

<mosaic_0001>
module attributes {stable_mosaic.version = 11 : i64} {
  func.func @mlp_kernel(%arg0: i32, %arg1: memref<8x8xf32, #tpu.memory_space<vmem>>, %arg2: memref<8x8xf32, #tpu.memory_space<vmem>>, %arg3: memref<1x8xf32, #tpu.memory_space<vmem>>, %arg4: memref<8x8xf32, #tpu.memory_space<vmem>>, %arg5: memref<1x8xf32, #tpu.memory_space<vmem>>, %arg6: memref<8x8xf32, #tpu.memory_space<vmem>>, %arg7: memref<1x8xf32, #tpu.memory_space<vmem>>, %arg8: memref<8x8xf32, #tpu.memory_space<vmem>>) attributes {dimension_semantics = [#tpu.dimension_semantics<parallel>], iteration_bounds = array<i64: 1>, scalar_prefetch = 0 : i64, scratch_operands = 0 : i64, tpu.core_type = #tpu.core_type<tc>, window_params = [{transform_indices = @transform_0, window_bounds = array<i64: 8, 8>}, {pipeline_mode = #tpu.pipeline_mode<synchronous>, transform_indices = @transform_1, window_bounds = array<i64: 8, 8>}, {pipeline_mode = #tpu.pipeline_mode<synchronous>, transform_indices = @transform_2, window_bounds = array<i64: 1, 8>}, {pipeline_mode = #tpu.pipeline_mode<synchronous>, transform_indices = @transform_3, window_bounds = array<i64: 8, 8>}, {pipeline_mode = #tpu.pipeline_mode<synchronous>, transform_indices = @transform_4, window_bounds = array<i64: 1, 8>}, {pipeline_mode = #tpu.pipeline_mode<synchronous>, transform_indices = @transform_5, window_bounds = array<i64: 8, 8>}, {pipeline_mode = #tpu.pipeline_mode<synchronous>, transform_indices = @transform_6, window_bounds = array<i64: 1, 8>}, {transform_indices = @transform_7, window_bounds = array<i64: 8, 8>}]} {
    %c0 = arith.constant 0 : index
    %c0_0 = arith.constant 0 : index
    %0 = vector.load %arg1[%c0, %c0_0] : memref<8x8xf32, #tpu.memory_space<vmem>>, vector<8x8xf32>
    %c0_1 = arith.constant 0 : index
    %c0_2 = arith.constant 0 : index
    %1 = vector.load %arg2[%c0_1, %c0_2] : memref<8x8xf32, #tpu.memory_space<vmem>>, vector<8x8xf32>
    %cst = arith.constant dense<0.000000e+00> : vector<8x8xf32>
    %2 = tpu.matmul %0, %1, %cst {dimension_numbers = #tpu.dot_dimension_numbers<[1], [0], [0], [1], [0, 0, 1, 1], [], []>} : vector<8x8xf32>, vector<8x8xf32>, vector<8x8xf32> -> vector<8x8xf32>
    %c0_3 = arith.constant 0 : index
    %c0_4 = arith.constant 0 : index
    %3 = vector.load %arg3[%c0_3, %c0_4] : memref<1x8xf32, #tpu.memory_space<vmem>>, vector<1x8xf32>
    %4 = vector.broadcast %3 : vector<1x8xf32> to vector<8x8xf32>
    %5 = arith.addf %2, %4 : vector<8x8xf32>
    %cst_5 = arith.constant 0.000000e+00 : f32
    %6 = vector.broadcast %cst_5 : f32 to vector<8x8xf32>
    %7 = arith.maximumf %5, %6 : vector<8x8xf32>
    %c0_6 = arith.constant 0 : index
    %c0_7 = arith.constant 0 : index
    %8 = vector.load %arg4[%c0_6, %c0_7] : memref<8x8xf32, #tpu.memory_space<vmem>>, vector<8x8xf32>
    %cst_8 = arith.constant dense<0.000000e+00> : vector<8x8xf32>
    %9 = tpu.matmul %7, %8, %cst_8 {dimension_numbers = #tpu.dot_dimension_numbers<[1], [0], [0], [1], [0, 0, 1, 1], [], []>} : vector<8x8xf32>, vector<8x8xf32>, vector<8x8xf32> -> vector<8x8xf32>
    %c0_9 = arith.constant 0 : index
    %c0_10 = arith.constant 0 : index
    %10 = vector.load %arg5[%c0_9, %c0_10] : memref<1x8xf32, #tpu.memory_space<vmem>>, vector<1x8xf32>
    %11 = vector.broadcast %10 : vector<1x8xf32> to vector<8x8xf32>
    %12 = arith.addf %9, %11 : vector<8x8xf32>
    %cst_11 = arith.constant 0.000000e+00 : f32
    %13 = vector.broadcast %cst_11 : f32 to vector<8x8xf32>
    %14 = arith.maximumf %12, %13 : vector<8x8xf32>
    %c0_12 = arith.constant 0 : index
    %c0_13 = arith.constant 0 : index
    %15 = vector.load %arg6[%c0_12, %c0_13] : memref<8x8xf32, #tpu.memory_space<vmem>>, vector<8x8xf32>
    %cst_14 = arith.constant dense<0.000000e+00> : vector<8x8xf32>
    %16 = tpu.matmul %14, %15, %cst_14 {dimension_numbers = #tpu.dot_dimension_numbers<[1], [0], [0], [1], [0, 0, 1, 1], [], []>} : vector<8x8xf32>, vector<8x8xf32>, vector<8x8xf32> -> vector<8x8xf32>
    %c0_15 = arith.constant 0 : index
    %c0_16 = arith.constant 0 : index
    %17 = vector.load %arg7[%c0_15, %c0_16] : memref<1x8xf32, #tpu.memory_space<vmem>>, vector<1x8xf32>
    %18 = vector.broadcast %17 : vector<1x8xf32> to vector<8x8xf32>
    %19 = arith.addf %16, %18 : vector<8x8xf32>
    %cst_17 = arith.constant 0.000000e+00 : f32
    %20 = vector.broadcast %cst_17 : f32 to vector<8x8xf32>
    %21 = arith.maximumf %19, %20 : vector<8x8xf32>
    %c0_18 = arith.constant 0 : index
    %c0_19 = arith.constant 0 : index
    %22 = vector.load %arg8[%c0_18, %c0_19] : memref<8x8xf32, #tpu.memory_space<vmem>>, vector<8x8xf32>
    tpu.vector_store %arg8[%c0_18, %c0_19], %21 {strides = array<i32>} : memref<8x8xf32, #tpu.memory_space<vmem>>, vector<8x8xf32>,
    return
  }
  func.func @transform_0(%arg0: i32) -> (i32, i32) {
    %c0_i32 = arith.constant 0 : i32
    %c0_i32_0 = arith.constant 0 : i32
    return %arg0, %c0_i32 : i32, i32
  }
  func.func @transform_1(%arg0: i32) -> (i32, i32) {
    %c0_i32 = arith.constant 0 : i32
    %c0_i32_0 = arith.constant 0 : i32
    %c0_i32_1 = arith.constant 0 : i32
    return %c0_i32, %c0_i32_0 : i32, i32
  }
  func.func @transform_2(%arg0: i32) -> (i32, i32) {
    %c0_i32 = arith.constant 0 : i32
    %c0_i32_0 = arith.constant 0 : i32
    %c0_i32_1 = arith.constant 0 : i32
    return %c0_i32, %c0_i32_0 : i32, i32
  }
  func.func @transform_3(%arg0: i32) -> (i32, i32) {
    %c0_i32 = arith.constant 0 : i32
    %c0_i32_0 = arith.constant 0 : i32
    %c0_i32_1 = arith.constant 0 : i32
    return %c0_i32, %c0_i32_0 : i32, i32
  }
  func.func @transform_4(%arg0: i32) -> (i32, i32) {
    %c0_i32 = arith.constant 0 : i32
    %c0_i32_0 = arith.constant 0 : i32
    %c0_i32_1 = arith.constant 0 : i32
    return %c0_i32, %c0_i32_0 : i32, i32
  }
  func.func @transform_5(%arg0: i32) -> (i32, i32) {
    %c0_i32 = arith.constant 0 : i32
    %c0_i32_0 = arith.constant 0 : i32
    %c0_i32_1 = arith.constant 0 : i32
    return %c0_i32, %c0_i32_0 : i32, i32
  }
  func.func @transform_6(%arg0: i32) -> (i32, i32) {
    %c0_i32 = arith.constant 0 : i32
    %c0_i32_0 = arith.constant 0 : i32
    %c0_i32_1 = arith.constant 0 : i32
    return %c0_i32, %c0_i32_0 : i32, i32
  }
  func.func @transform_7(%arg0: i32) -> (i32, i32) {
    %c0_i32 = arith.constant 0 : i32
    %c0_i32_0 = arith.constant 0 : i32
    return %arg0, %c0_i32 : i32, i32
  }
}

</mosaic_0001>

<bundles_post_ra>
// kernel: mlp_forward.1
= control target key start
LH: loop header
LB: loop body
LE: loop exit
PB: predicated region body
PF: predicated region fallthrough
CT: control target
= control target key end

     0   :  { %12 = vsyncpa [#allocation3], 0  ;;  %s346_s24 = smov [#allocation2]   ;;  %s426_s0 = inlined_call_operand.vmem [shape: f32[8,8], index: 0, kind: input, shape index: {}]   ;;  %s427_s1 = inlined_call_operand.vmem [shape: f32[8,8], index: 1, kind: input, shape index: {}]   ;;  %s428_s2 = inlined_call_operand.vmem [shape: f32[1,8], index: 2, kind: input, shape index: {}]   ;;  %s429_s3 = inlined_call_operand.vmem [shape: f32[8,8], index: 3, kind: input, shape index: {}]   ;;  %s430_s4 = inlined_call_operand.vmem [shape: f32[1,8], index: 4, kind: input, shape index: {}]   ;;  %s431_s5 = inlined_call_operand.vmem [shape: f32[8,8], index: 5, kind: input, shape index: {}]   ;;  %s432_s6 = inlined_call_operand.hbm [shape: f32[1,8], index: 6, kind: input, shape index: {}]   ;;  %s433_s7 = inlined_call_operand.vmem [shape: f32[8,8], index: 7, kind: output, shape index: {}]  }
   0x1   :  { %s31_s25 = sshll.u32 %s346_s24, 4  ;;  %s322_s28 = scalar_lea.hbm %s432_s6, 16  ;;  %s32_s25 = int_to_ptr.vmem [resolvable:$true] %s31_s25 }
   0x2   :  { %p323_p0 = scmp.ne.s32.totalorder %s432_s6, %s322_s28  ;;  %p326_p1 = scmp.lt.u32.totalorder %s322_s28, %s432_s6 }
   0x4   :  { %p328_p2 = pnand %p326_p1, %p323_p0 }
   0x6   :  { %331 = shalt.err (!%p328_p2)
}
   0x7   :  { %s332_s10 = scalar_lea.vmem %s32_s25, 16  ;;  %s336_s11 = scalar_lea.vmem %s32_s25, 32 }
   0x8   :  { %p333_p3 = scmp.ne.s32.totalorder %s32_s25, %s332_s10  ;;  %p337_p4 = scmp.lt.s32.totalorder %s32_s25, %s32_s25 }
   0x9   :  { %p338_p5 = scmp.lt.s32.totalorder %s336_s11, %s332_s10 }
   0xb   :  { %p339_p6 = por %p338_p5, %p337_p4 }
   0xd   :  { %p340_p7 = pnand %p339_p6, %p333_p3 }
   0xf   :  { %343 = shalt.err (!%p340_p7)
}
  0x10   :  { %34 = dma.hbm_to_vmem [thread:$0]  %s432_s6, 16, %s32_s25, [#allocation3]  }
  0x11   :  { %344 = dma.done.wait [#allocation3], 16  }
  0x12   :  { %345 = vsyncadd [#allocation3], 4294967280  ;;  %v347_v0 = vmov 0.0   ;;  %vm348_vm0 = vmmov 0   ;;  %vm47_vm1 = vcmask 64512   ;;  %v39_v1 = vld [vmem:[%s427_s1] sm:$0xff] }
  0x13   :  { %304 = vmatprep.subr.mxu0 %v347_v0  ;;  %306 = vmatprep.mubr.msk.f32.mxu0 %vm348_vm0, %v347_v0  ;;  %v38_v2 = vld [vmem:[%s426_s0] sm:$0xff]  ;;  %v296_v15 = vld [vmem:[#allocation2] ss:$0 sm:$0xff] }
  0x14   :  { %309 = vmatprep.subr.mxu1 %v347_v0  ;;  %311 = vmatprep.mubr.msk.f32.mxu1 %vm348_vm0, %v347_v0  ;;  %v122_v3 = vld [vmem:[%s429_s3] sm:$0xff] }
  0x15   :  { %305 = vmatpush3.msra.mxu0 %v39_v1  ;;  %310 = vmatpush3.msra.mxu1 %v122_v3  ;;  %v292_v4 = vld [vmem:[%s428_s2] ss:$0 sm:$0xff] }
  0x16   :  { %307 = vmatmul.mubr.msk.f32.vlgmr.msra.gmra.mrb[0].mxu0 %vm47_vm1, %v38_v2  ;;  %314 = vmatprep.subr.mxu0 %v347_v0  ;;  %v204_v9 = vld [vmem:[%s431_s5] sm:$0xff] }
  0x17   :  { %316 = vmatprep.mubr.msk.f32.mxu0 %vm348_vm0, %v347_v0  ;;  %315 = vmatpush3.msra.mxu0 %v204_v9  ;;  %v294_v10 = vld [vmem:[%s430_s4] ss:$0 sm:$0xff] }
  0xe9   :  { %v117_v5 = vpop.f32.mrb[0].mxu0 }
  0xea   :  { %v118_v6 = vadd.f32 %v292_v4, %v117_v5  ;;  %v308_v7 = vpop.f32.mrb[1].mxu0 }
  0xec   :  { %v121_v8 = vmax.f32 %v118_v6, 0.0 }
  0xee   :  { %312 = vmatmul.mubr.msk.f32.vlgmr.msra.gmra.mrb[0].mxu1 %vm47_vm1, %v121_v8 }
 0x1c1   :  { %v199_v11 = vpop.f32.mrb[0].mxu1 }
 0x1c2   :  { %v200_v12 = vadd.f32 %v294_v10, %v199_v11  ;;  %v313_v13 = vpop.f32.mrb[1].mxu1 }
 0x1c4   :  { %v203_v14 = vmax.f32 %v200_v12, 0.0 }
 0x1c6   :  { %317 = vmatmul.mubr.msk.f32.vlgmr.msra.gmra.mrb[2].mxu0 %vm47_vm1, %v203_v14 }
 0x299   :  { %v281_v16 = vpop.f32.mrb[2].mxu0 }
 0x29a   :  { %v282_v17 = vadd.f32 %v296_v15, %v281_v16  ;;  %v318_v18 = vpop.f32.mrb[3].mxu0 }
 0x29c   :  { %v285_v19 = vmax.f32 %v282_v17, 0.0 }
 0x29e   :  { %286 = vst.msk [vmem:[%s433_s7] sm:$0xff] %vm47_vm1, %v285_v19 }
 0x29f   :  { %291 = vsyncpa [#allocation3], 1 }

</bundles_post_ra>
